<compile_context>
chip_gen: v7x
topology: tpu7x:2x2x1
jax: 0.10.0
libtpu: 0.0.40
codegen_flags: <defaults>
</compile_context>

<pallas_src>
import jax
import jax.numpy as jnp
from jax.experimental import pallas as pl
from jax.experimental.pallas import tpu as pltpu


def _round_up(v: int, m: int) -> int:
    return ((v + m - 1) // m) * m


def _mlp_kernel(x_ref, w1_ref, b1_ref, w2_ref, b2_ref, o_ref):
    # Hidden layer: (tile_n, D_in) @ (D_in, H_p) + (1, H_p) on the MXU.
    h = jnp.dot(x_ref[...], w1_ref[...], preferred_element_type=jnp.float32)
    h = h + b1_ref[...]
    # sigmoid(h) = 0.5 * tanh(0.5*h) + 0.5  -> single EUP transcendental.
    h = 0.5 * jnp.tanh(0.5 * h) + 0.5
    # Output layer: (tile_n, H_p) @ (H_p, D_out) + (1, D_out).
    out = jnp.dot(h.astype(w2_ref.dtype), w2_ref[...],
                  preferred_element_type=jnp.float32)
    out = out + b2_ref[...]
    o_ref[...] = out.astype(o_ref.dtype)


def net_forward(x, w1, b1, w2, b2, *, tile_n=None):
    """Two-layer MLP forward pass as a single Pallas TPU kernel.

    x  : (N, D_in)
    w1 : (D_in, H),  b1 : (H,) or (1, H)
    w2 : (H, D_out), b2 : (D_out,) or (1, D_out)
    returns (N, D_out)
    """
    N, D_in = x.shape
    H = w1.shape[1]
    D_out = w2.shape[1]
    bytes_per = jnp.dtype(x.dtype).itemsize

    # --- Pad only the hidden dim to a lane-dense multiple of 128 (exact). ---
    h_p = _round_up(H, 128)
    if h_p != H:
        w1p = jnp.pad(w1, ((0, 0), (0, h_p - H)))
        b1p = jnp.pad(jnp.reshape(b1, (1, H)), ((0, 0), (0, h_p - H)))
        w2p = jnp.pad(w2, ((0, h_p - H), (0, 0)))
    else:
        w1p = w1
        b1p = jnp.reshape(b1, (1, H))
        w2p = w2
    b2p = jnp.reshape(b2, (1, D_out))

    # --- Per-generation VMEM budget (v5e/v6e: 128 MiB, v7x: 64 MiB per TC). ---
    try:
        vmem_cap = int(pltpu.get_tpu_info().vmem_capacity_bytes)
    except Exception:
        vmem_cap = 128 * 1024 * 1024
    vmem_limit = max(16 * 1024 * 1024, (vmem_cap * 3) // 4)
    vmem_budget = (vmem_limit * 9) // 10  # headroom for internal scratch

    weight_bytes = bytes_per * (D_in * h_p + h_p + h_p * D_out + D_out)
    if weight_bytes > vmem_budget // 2:
        # TODO(synk): tile D_in / H with an "arbitrary" reduction grid axis and
        # a VMEM accumulator instead of keeping w1/w2 fully resident.
        raise ValueError(
            f"weights ({weight_bytes} B) too large for resident-weight kernel "
            f"(budget {vmem_budget} B); K/H-tiled fallback not implemented")

    # --- Pick tile_n from the VMEM model (incl. f32 hidden + f32 out acc). ---
    per_row_bytes = (2 * bytes_per * D_in      # double-buffered x tile
                     + 2 * bytes_per * D_out   # double-buffered out tile
                     + 4 * h_p                 # f32 hidden activation
                     + 4 * D_out)              # f32 output accumulator
    if tile_n is None:
        fit_rows = max(8, ((vmem_budget - weight_bytes) // per_row_bytes)
                       // 8 * 8)
        # >= 2 grid steps so both v7x TensorCores get work (free on 1-TC chips).
        half_n = _round_up(max(1, -(-N // 2)), 8)
        tile_n = int(max(8, min(fit_rows, 8192, half_n)))
    else:
        tile_n = max(8, (int(tile_n) // 8) * 8)

    # --- At most one cheap row-only pad of x. ---
    n_pad = _round_up(N, tile_n)
    xp = jnp.pad(x, ((0, n_pad - N), (0, 0))) if n_pad != N else x
    grid = (n_pad // tile_n,)

    cost = pl.CostEstimate(
        flops=2 * n_pad * (D_in * h_p + h_p * D_out),
        transcendentals=n_pad * h_p,
        bytes_accessed=bytes_per * (n_pad * D_in + D_in * h_p + h_p
                                    + h_p * D_out + D_out + n_pad * D_out),
    )

    out_padded = pl.pallas_call(
        _mlp_kernel,
        out_shape=jax.ShapeDtypeStruct((n_pad, D_out), x.dtype),
        grid_spec=pltpu.PrefetchScalarGridSpec(
            num_scalar_prefetch=0,
            grid=grid,
            in_specs=[
                # x: full D_in per block (full-dim block is exempt from the
                # 128-lane rule) -> no feature padding, minimal HBM traffic.
                pl.BlockSpec((tile_n, D_in), lambda i: (i, 0)),
                # Loop-invariant params: fully resident in VMEM, single copy.
                pl.BlockSpec(memory_space=pltpu.MemorySpace.VMEM),  # w1
                pl.BlockSpec(memory_space=pltpu.MemorySpace.VMEM),  # b1
                pl.BlockSpec(memory_space=pltpu.MemorySpace.VMEM),  # w2
                pl.BlockSpec(memory_space=pltpu.MemorySpace.VMEM),  # b2
            ],
            out_specs=pl.BlockSpec((tile_n, D_out), lambda i: (i, 0)),
        ),
        compiler_params=pltpu.CompilerParams(
            dimension_semantics=("parallel",),
            vmem_limit_bytes=int(vmem_limit),
        ),
        cost_estimate=cost,
    )(xp, w1p, b1p, w2p, b2p)

    return out_padded[:N] if n_pad != N else out_padded


def reference_forward(x, w1, b1, w2, b2):
    h = jax.nn.sigmoid(x @ w1 + jnp.reshape(b1, (1, -1)))
    return h @ w2 + jnp.reshape(b2, (1, -1))


if __name__ == "__main__":
    # Shapes consistent with Net(D_in, D_out, H).
    N, D_in, H, D_out = 8, 32, 16, 8

    key = jax.random.PRNGKey(0)
    k_x, k_w1, k_b1, k_w2, k_b2, k_x2 = jax.random.split(key, 6)

    x = jax.random.normal(k_x, (N, D_in), dtype=jnp.float32)
    # Deterministic parameter init (uniform, roughly PyTorch-style scale).
    w1 = jax.random.uniform(k_w1, (D_in, H), jnp.float32,
                            -1.0 / D_in ** 0.5, 1.0 / D_in ** 0.5)
    b1 = jax.random.uniform(k_b1, (H,), jnp.float32,
                            -1.0 / D_in ** 0.5, 1.0 / D_in ** 0.5)
    w2 = jax.random.uniform(k_w2, (H, D_out), jnp.float32,
                            -1.0 / H ** 0.5, 1.0 / H ** 0.5)
    b2 = jax.random.uniform(k_b2, (D_out,), jnp.float32,
                            -1.0 / H ** 0.5, 1.0 / H ** 0.5)

    # Case 1: small batch, auto tile_n.
    out = jax.block_until_ready(net_forward(x, w1, b1, w2, b2))
    ref = reference_forward(x, w1, b1, w2, b2)
    assert out.shape == (N, D_out)
    assert jnp.allclose(out, ref, atol=1e-4, rtol=1e-4), "mismatch (case 1)"

    # Case 2: batch not a multiple of the tile -> one row pad, multi-step grid.
    N2 = 300
    x2 = jax.random.normal(k_x2, (N2, D_in), dtype=jnp.float32)
    out2 = jax.block_until_ready(net_forward(x2, w1, b1, w2, b2, tile_n=64))
    ref2 = reference_forward(x2, w1, b1, w2, b2)
    assert out2.shape == (N2, D_out)
    assert jnp.allclose(out2, ref2, atol=1e-4, rtol=1e-4), "mismatch (case 2)"

    print("KERNEL_OK")
</pallas_src>

<mosaic_0001>
module attributes {stable_mosaic.version = 11 : i64} {
  func.func @_mlp_kernel(%arg0: i32, %arg1: memref<8x32xf32, #tpu.memory_space<vmem>>, %arg2: memref<32x128xf32, #tpu.memory_space<vmem>>, %arg3: memref<1x128xf32, #tpu.memory_space<vmem>>, %arg4: memref<128x8xf32, #tpu.memory_space<vmem>>, %arg5: memref<1x8xf32, #tpu.memory_space<vmem>>, %arg6: memref<8x8xf32, #tpu.memory_space<vmem>>) attributes {dimension_semantics = [#tpu.dimension_semantics<parallel>], iteration_bounds = array<i64: 1>, scalar_prefetch = 0 : i64, scratch_operands = 0 : i64, tpu.core_type = #tpu.core_type<tc>, window_params = [{transform_indices = @transform_0, window_bounds = array<i64: 8, 32>}, {pipeline_mode = #tpu.pipeline_mode<synchronous>, transform_indices = @transform_1, window_bounds = array<i64: 32, 128>}, {pipeline_mode = #tpu.pipeline_mode<synchronous>, transform_indices = @transform_2, window_bounds = array<i64: 1, 128>}, {pipeline_mode = #tpu.pipeline_mode<synchronous>, transform_indices = @transform_3, window_bounds = array<i64: 128, 8>}, {pipeline_mode = #tpu.pipeline_mode<synchronous>, transform_indices = @transform_4, window_bounds = array<i64: 1, 8>}, {transform_indices = @transform_5, window_bounds = array<i64: 8, 8>}]} {
    %c0 = arith.constant 0 : index
    %c0_0 = arith.constant 0 : index
    %0 = vector.load %arg1[%c0, %c0_0] : memref<8x32xf32, #tpu.memory_space<vmem>>, vector<8x32xf32>
    %c0_1 = arith.constant 0 : index
    %c0_2 = arith.constant 0 : index
    %1 = vector.load %arg2[%c0_1, %c0_2] : memref<32x128xf32, #tpu.memory_space<vmem>>, vector<32x128xf32>
    %cst = arith.constant dense<0.000000e+00> : vector<8x128xf32>
    %2 = tpu.matmul %0, %1, %cst {dimension_numbers = #tpu.dot_dimension_numbers<[1], [0], [0], [1], [0, 0, 1, 1], [], []>} : vector<8x32xf32>, vector<32x128xf32>, vector<8x128xf32> -> vector<8x128xf32>
    %c0_3 = arith.constant 0 : index
    %c0_4 = arith.constant 0 : index
    %3 = vector.load %arg3[%c0_3, %c0_4] : memref<1x128xf32, #tpu.memory_space<vmem>>, vector<1x128xf32>
    %4 = vector.broadcast %3 : vector<1x128xf32> to vector<8x128xf32>
    %5 = arith.addf %2, %4 : vector<8x128xf32>
    %cst_5 = arith.constant 5.000000e-01 : f32
    %6 = vector.broadcast %cst_5 : f32 to vector<8x128xf32>
    %7 = arith.mulf %6, %5 : vector<8x128xf32>
    %8 = math.tanh %7 : vector<8x128xf32>
    %cst_6 = arith.constant 5.000000e-01 : f32
    %9 = vector.broadcast %cst_6 : f32 to vector<8x128xf32>
    %10 = arith.mulf %9, %8 : vector<8x128xf32>
    %cst_7 = arith.constant 5.000000e-01 : f32
    %11 = vector.broadcast %cst_7 : f32 to vector<8x128xf32>
    %12 = arith.addf %10, %11 : vector<8x128xf32>
    %c0_8 = arith.constant 0 : index
    %c0_9 = arith.constant 0 : index
    %13 = vector.load %arg4[%c0_8, %c0_9] : memref<128x8xf32, #tpu.memory_space<vmem>>, vector<128x8xf32>
    %cst_10 = arith.constant dense<0.000000e+00> : vector<8x8xf32>
    %14 = tpu.matmul %12, %13, %cst_10 {dimension_numbers = #tpu.dot_dimension_numbers<[1], [0], [0], [1], [0, 0, 1, 1], [], []>} : vector<8x128xf32>, vector<128x8xf32>, vector<8x8xf32> -> vector<8x8xf32>
    %c0_11 = arith.constant 0 : index
    %c0_12 = arith.constant 0 : index
    %15 = vector.load %arg5[%c0_11, %c0_12] : memref<1x8xf32, #tpu.memory_space<vmem>>, vector<1x8xf32>
    %16 = vector.broadcast %15 : vector<1x8xf32> to vector<8x8xf32>
    %17 = arith.addf %14, %16 : vector<8x8xf32>
    %c0_13 = arith.constant 0 : index
    %c0_14 = arith.constant 0 : index
    %18 = vector.load %arg6[%c0_13, %c0_14] : memref<8x8xf32, #tpu.memory_space<vmem>>, vector<8x8xf32>
    tpu.vector_store %arg6[%c0_13, %c0_14], %17 {strides = array<i32>} : memref<8x8xf32, #tpu.memory_space<vmem>>, vector<8x8xf32>,
    return
  }
  func.func @transform_0(%arg0: i32) -> (i32, i32) {
    %c0_i32 = arith.constant 0 : i32
    %c0_i32_0 = arith.constant 0 : i32
    return %arg0, %c0_i32 : i32, i32
  }
  func.func @transform_1(%arg0: i32) -> (i32, i32) {
    %c0_i32 = arith.constant 0 : i32
    %c0_i32_0 = arith.constant 0 : i32
    %c0_i32_1 = arith.constant 0 : i32
    return %c0_i32, %c0_i32_0 : i32, i32
  }
  func.func @transform_2(%arg0: i32) -> (i32, i32) {
    %c0_i32 = arith.constant 0 : i32
    %c0_i32_0 = arith.constant 0 : i32
    %c0_i32_1 = arith.constant 0 : i32
    return %c0_i32, %c0_i32_0 : i32, i32
  }
  func.func @transform_3(%arg0: i32) -> (i32, i32) {
    %c0_i32 = arith.constant 0 : i32
    %c0_i32_0 = arith.constant 0 : i32
    %c0_i32_1 = arith.constant 0 : i32
    return %c0_i32, %c0_i32_0 : i32, i32
  }
  func.func @transform_4(%arg0: i32) -> (i32, i32) {
    %c0_i32 = arith.constant 0 : i32
    %c0_i32_0 = arith.constant 0 : i32
    %c0_i32_1 = arith.constant 0 : i32
    return %c0_i32, %c0_i32_0 : i32, i32
  }
  func.func @transform_5(%arg0: i32) -> (i32, i32) {
    %c0_i32 = arith.constant 0 : i32
    %c0_i32_0 = arith.constant 0 : i32
    return %arg0, %c0_i32 : i32, i32
  }
}

</mosaic_0001>

<bundles_post_ra>
// kernel: tpu_custom_call.1
= control target key start
LH: loop header
LB: loop body
LE: loop exit
PB: predicated region body
PF: predicated region fallthrough
CT: control target
= control target key end

     0   :  { %10 = vsyncpa [#allocation3], 0  ;;  %s652_s0 = inlined_call_operand.hbm [shape: f32[8,32], index: 0, kind: input, shape index: {}]   ;;  %s653_s1 = inlined_call_operand.hbm [shape: f32[32,128], index: 1, kind: input, shape index: {}]   ;;  %s654_s2 = inlined_call_operand.hbm [shape: f32[1,128], index: 2, kind: input, shape index: {}]   ;;  %s655_s3 = inlined_call_operand.hbm [shape: f32[128,8], index: 3, kind: input, shape index: {}]   ;;  %s656_s4 = inlined_call_operand.hbm [shape: f32[1,8], index: 4, kind: input, shape index: {}]   ;;  %s657_s5 = inlined_call_operand.hbm [shape: f32[8,8], index: 5, kind: output, shape index: {}]  }
   0x1   :  { %11 = vsyncpa [#allocation6], 0 }
   0x2   :  { %12 = vsyncpa [#allocation9], 0 }
   0x3   :  { %13 = vsyncpa [#allocation4], 0  ;;  %s539_s18 = smov [#allocation5]   ;;  %s399_s22 = scalar_lea.hbm %s653_s1, 512 }
   0x4   :  { %s29_s19 = sshll.u32 %s539_s18, 4  ;;  %p400_p0 = scmp.ne.s32.totalorder %s653_s1, %s399_s22  ;;  %s30_s19 = int_to_ptr.vmem [resolvable:$true] %s29_s19 }
   0x5   :  { %p403_p1 = scmp.lt.u32.totalorder %s399_s22, %s653_s1 }
   0x7   :  { %p405_p2 = pnand %p403_p1, %p400_p0 }
   0x9   :  { %408 = shalt.err (!%p405_p2)
}
   0xa   :  { %s409_s27 = scalar_lea.vmem %s30_s19, 512  ;;  %p414_p4 = scmp.lt.s32.totalorder %s30_s19, %s30_s19 }
   0xb   :  { %p410_p3 = scmp.ne.s32.totalorder %s30_s19, %s409_s27  ;;  %p415_p5 = scmp.lt.s32.totalorder %s409_s27, %s409_s27 }
   0xd   :  { %p416_p6 = por %p415_p5, %p414_p4 }
   0xf   :  { %p417_p7 = pnand %p416_p6, %p410_p3 }
  0x11   :  { %420 = shalt.err (!%p417_p7)
}
  0x12   :  { %s540_s28 = smov 128   ;;  %s541_s29 = smov 8  }
  0x13   :  { %35 = dma.hbm_to_vmem [thread:$0]  %s653_s1, 512, %s30_s19, [#allocation6], %s540_s28, %s540_s28, %s541_s29  }
  0x14   :  { %s542_s7 = smov [#allocation8]   ;;  %s543_s9 = smov [#allocation2]  }
  0x15   :  { %s51_s8 = sshll.u32 %s542_s7, 4  ;;  %s20_s10 = sshll.u32 %s543_s9, 4  ;;  %s52_s8 = int_to_ptr.vmem [resolvable:$true] %s51_s8  ;;  %s21_s10 = int_to_ptr.vmem [resolvable:$true] %s20_s10 }
  0x16   :  { %s421_s13 = scalar_lea.hbm %s655_s3, 2048 }
  0x17   :  { %p422_p8 = scmp.ne.s32.totalorder %s655_s3, %s421_s13  ;;  %p425_p9 = scmp.lt.u32.totalorder %s421_s13, %s655_s3 }
  0x19   :  { %p427_p10 = pnand %p425_p9, %p422_p8 }
  0x1b   :  { %430 = shalt.err (!%p427_p10)
}
  0x1c   :  { %s431_s1 = scalar_lea.vmem %s52_s8, 2048  ;;  %p436_p12 = scmp.lt.s32.totalorder %s52_s8, %s52_s8 }
  0x1d   :  { %p432_p11 = scmp.ne.s32.totalorder %s52_s8, %s431_s1  ;;  %p437_p13 = scmp.lt.s32.totalorder %s431_s1, %s431_s1 }
  0x1f   :  { %p438_p0 = por %p437_p13, %p436_p12 }
  0x21   :  { %p439_p1 = pnand %p438_p0, %p432_p11 }
  0x23   :  { %442 = shalt.err (!%p439_p1)
}
  0x24   :  { %57 = dma.hbm_to_vmem [thread:$0]  %s655_s3, 2048, %s52_s8, [#allocation9], %s540_s28, %s540_s28, %s541_s29  }
  0x25   :  { %s443_s22 = scalar_lea.hbm %s652_s0, 128 }
  0x26   :  { %p444_p2 = scmp.ne.s32.totalorder %s652_s0, %s443_s22  ;;  %p447_p3 = scmp.lt.u32.totalorder %s443_s22, %s652_s0 }
  0x28   :  { %p449_p4 = pnand %p447_p3, %p444_p2 }
  0x2a   :  { %452 = shalt.err (!%p449_p4)
}
  0x2b   :  { %s453_s27 = scalar_lea.vmem %s21_s10, 128  ;;  %p458_p6 = scmp.lt.s32.totalorder %s21_s10, %s21_s10 }
  0x2c   :  { %p454_p5 = scmp.ne.s32.totalorder %s21_s10, %s453_s27  ;;  %p459_p7 = scmp.lt.s32.totalorder %s453_s27, %s453_s27 }
  0x2e   :  { %p460_p8 = por %p459_p7, %p458_p6 }
  0x30   :  { %p461_p9 = pnand %p460_p8, %p454_p5 }
  0x32   :  { %464 = shalt.err (!%p461_p9)
}
  0x33   :  { %23 = dma.hbm_to_vmem [thread:$0]  %s652_s0, 128, %s21_s10, [#allocation3]  }
  0x34   :  { %s544_s29 = smov [#allocation7]   ;;  %s545_s6 = smov [#allocation10]  }
  0x35   :  { %s42_s30 = sshll.u32 %s544_s29, 4  ;;  %s64_s7 = sshll.u32 %s545_s6, 4  ;;  %s43_s30 = int_to_ptr.vmem [resolvable:$true] %s42_s30  ;;  %s65_s7 = int_to_ptr.vmem [resolvable:$true] %s64_s7 }
  0x36   :  { %s465_s11 = scalar_lea.hbm %s654_s2, 16 }
  0x37   :  { %p466_p10 = scmp.ne.s32.totalorder %s654_s2, %s465_s11  ;;  %p469_p11 = scmp.lt.u32.totalorder %s465_s11, %s654_s2 }
  0x39   :  { %p471_p12 = pnand %p469_p11, %p466_p10 }
  0x3b   :  { %474 = shalt.err (!%p471_p12)
}
  0x3c   :  { %s475_s0 = scalar_lea.vmem %s43_s30, 16  ;;  %s479_s10 = scalar_lea.vmem %s43_s30, 32 }
  0x3d   :  { %p476_p13 = scmp.ne.s32.totalorder %s43_s30, %s475_s0  ;;  %p480_p0 = scmp.lt.s32.totalorder %s43_s30, %s43_s30 }
  0x3e   :  { %p481_p1 = scmp.lt.s32.totalorder %s479_s10, %s475_s0 }
  0x40   :  { %p482_p2 = por %p481_p1, %p480_p0 }
  0x42   :  { %p483_p3 = pnand %p482_p2, %p476_p13 }
  0x44   :  { %486 = shalt.err (!%p483_p3)
}
  0x45   :  { %45 = dma.hbm_to_vmem [thread:$0]  %s654_s2, 16, %s43_s30, [#allocation6]  }
  0x46   :  { %s487_s19 = scalar_lea.hbm %s656_s4, 16 }
  0x47   :  { %p488_p4 = scmp.ne.s32.totalorder %s656_s4, %s487_s19  ;;  %p491_p5 = scmp.lt.u32.totalorder %s487_s19, %s656_s4 }
  0x49   :  { %p493_p6 = pnand %p491_p5, %p488_p4 }
  0x4b   :  { %496 = shalt.err (!%p493_p6)
}
  0x4c   :  { %s497_s24 = scalar_lea.vmem %s65_s7, 16  ;;  %s501_s25 = scalar_lea.vmem %s65_s7, 32 }
  0x4d   :  { %p498_p7 = scmp.ne.s32.totalorder %s65_s7, %s497_s24  ;;  %p502_p8 = scmp.lt.s32.totalorder %s65_s7, %s65_s7 }
  0x4e   :  { %p503_p9 = scmp.lt.s32.totalorder %s501_s25, %s497_s24 }
  0x50   :  { %p504_p10 = por %p503_p9, %p502_p8 }
  0x52   :  { %p505_p11 = pnand %p504_p10, %p498_p7 }
  0x54   :  { %508 = shalt.err (!%p505_p11)
}
  0x55   :  { %67 = dma.hbm_to_vmem [thread:$0]  %s656_s4, 16, %s65_s7, [#allocation9]  }
  0x56   :  { %531 = dma.done.wait [#allocation3], 128  }
  0x57   :  { %532 = vsyncadd [#allocation3], 4294967168 }
  0x58   :  { %533 = dma.done.wait [#allocation6], 528  }
  0x59   :  { %534 = vsyncadd [#allocation6], 4294966768 }
  0x5a   :  { %535 = dma.done.wait [#allocation9], 2064  }
  0x5b   :  { %536 = vsyncadd [#allocation9], 4294965232  ;;  %v546_v0 = vmov 0.0|0.0   ;;  %vm547_vm0 = vmmov 0   ;;  %v548_v1 = vmov 0.0   ;;  %v84_v2 = vld [vmem:[#allocation5] sm:$0xff] }
  0x5c   :  { %356 = vmatprep.subr.bf16.mxu0 %v546_v0  ;;  %318 = vmatprep.mubr.msk.f32.mxu0 %vm547_vm0, %v548_v1  ;;  %v85_v3 = vld [vmem:[#allocation5 + $0x8] sm:$0xff]  ;;  %v86_v4 = vld [vmem:[#allocation5 + $0x10] sm:$0xff]  ;;  %v87_v6 = vld [vmem:[#allocation5 + $0x18] sm:$0xff]  ;;  %vm95_vm1 = vcmask 261120   ;;  %s549_s4 = smov [#allocation11]   ;;  %vm266_vm2 = vcmask 64512  }
  0x5d   :  { %362 = vmatprep.subr.bf16.mxu1 %v546_v0  ;;  %353 = vmatprep.mubr.msk.f32.mxu1 %vm547_vm0, %v548_v1  ;;  %v357_v5 = vpack.c.bf16 %v85_v3, %v84_v2  ;;  %v173_v7 = vld [vmem:[#allocation8] sm:$0xff]  ;;  %v174_v8 = vld [vmem:[#allocation8 + $0x8] sm:$0xff]  ;;  %v175_v9 = vld [vmem:[#allocation8 + $0x10] sm:$0xff]  ;;  %v360_v11 = vpack.c.bf16 %v87_v6, %v86_v4  ;;  %s274_s27 = sshll.u32 %s549_s4, 4  ;;  %s275_s27 = int_to_ptr.vmem [resolvable:$true] %s274_s27 }
  0x5e   :  { %v176_v10 = vld [vmem:[#allocation8 + $0x18] sm:$0xff]  ;;  %v363_v12 = vpack.c.bf16 %v174_v8, %v173_v7  ;;  %v177_v14 = vld [vmem:[#allocation8 + $0x20] sm:$0xff]  ;;  %v178_v15 = vld [vmem:[#allocation8 + $0x28] sm:$0xff]  ;;  %s509_s3 = scalar_lea.vmem %s275_s27, 128  ;;  %p514_p13 = scmp.lt.s32.totalorder %s275_s27, %s275_s27 }
  0x5f   :  { %358 = vmatpush3.bf16.msra.mxu0 %v357_v5  ;;  %v366_v13 = vpack.c.bf16 %v176_v10, %v175_v9  ;;  %v83_v16 = vld [vmem:[#allocation2] sm:$0xff]  ;;  %v369_v17 = vpack.c.bf16 %v178_v15, %v177_v14  ;;  %v181_v21 = vld [vmem:[#allocation8 + $0x40] sm:$0xff]  ;;  %v182_v22 = vld [vmem:[#allocation8 + $0x48] sm:$0xff]  ;;  %p510_p12 = scmp.ne.s32.totalorder %s275_s27, %s509_s3  ;;  %p515_p0 = scmp.lt.s32.totalorder %s509_s3, %s509_s3 }
  0x60   :  { %359 = vmatprep.subr.bf16.mxu0 %v546_v0  ;;  %364 = vmatpush3.bf16.msra.mxu1 %v363_v12  ;;  %v179_v18 = vld [vmem:[#allocation8 + $0x30] sm:$0xff]  ;;  %v180_v19 = vld [vmem:[#allocation8 + $0x38] sm:$0xff]  ;;  %v375_v23 = vpack.c.bf16 %v182_v22, %v181_v21  ;;  %v185_v27 = vld [vmem:[#allocation8 + $0x60] sm:$0xff] }
  0x61   :  { %365 = vmatprep.subr.bf16.mxu1 %v546_v0  ;;  %v372_v20 = vpack.c.bf16 %v180_v19, %v179_v18  ;;  %v183_v24 = vld [vmem:[#allocation8 + $0x50] sm:$0xff]  ;;  %v184_v25 = vld [vmem:[#allocation8 + $0x58] sm:$0xff]  ;;  %v186_v28 = vld [vmem:[#allocation8 + $0x68] sm:$0xff]  ;;  %p516_p1 = por %p515_p0, %p514_p13 }
  0x62   :  { %v378_v26 = vpack.c.bf16 %v184_v25, %v183_v24  ;;  %v381_v29 = vpack.c.bf16 %v186_v28, %v185_v27  ;;  %v187_v30 = vld [vmem:[#allocation8 + $0x70] sm:$0xff]  ;;  %v188_v31 = vld [vmem:[#allocation8 + $0x78] sm:$0xff]  ;;  %v287_v41 = vld [vmem:[#allocation10] ss:$0 sm:$0xff] }
  0x63   :  { %361 = vmatpush3.bf16.msra.mxu0 %v360_v11  ;;  %v384_v32 = vpack.c.bf16 %v188_v31, %v187_v30  ;;  %v285_v33 = vld [vmem:[#allocation7] ss:$0 sm:$0xff]  ;;  %p517_p2 = pnand %p516_p1, %p510_p12 }
  0x64   :  { %367 = vmatpush3.bf16.msra.mxu1 %v366_v13 }
  0x65   :  { %368 = vmatprep.subr.bf16.mxu1 %v546_v0 }
  0x66   :  { %319 = vmatmul.mubr.msk.f32.vlgmr.msra.gmra.mrb[0].mxu0 %vm95_vm1, %v83_v16 }
  0x68   :  { %370 = vmatpush3.bf16.msra.mxu1 %v369_v17 }
  0x69   :  { %371 = vmatprep.subr.bf16.mxu1 %v546_v0 }
  0x6c   :  { %373 = vmatpush3.bf16.msra.mxu1 %v372_v20 }
  0x6d   :  { %374 = vmatprep.subr.bf16.mxu1 %v546_v0 }
  0x70   :  { %376 = vmatpush3.bf16.msra.mxu1 %v375_v23 }
  0x71   :  { %377 = vmatprep.subr.bf16.mxu1 %v546_v0 }
  0x74   :  { %379 = vmatpush3.bf16.msra.mxu1 %v378_v26 }
  0x75   :  { %380 = vmatprep.subr.bf16.mxu1 %v546_v0 }
  0x78   :  { %382 = vmatpush3.bf16.msra.mxu1 %v381_v29 }
  0x79   :  { %383 = vmatprep.subr.bf16.mxu1 %v546_v0 }
  0x7c   :  { %385 = vmatpush3.bf16.msra.mxu1 %v384_v32 }
 0x139   :  { %v165_v34 = vpop.f32.mrb[0].mxu0 }
 0x13a   :  { %v166_v35 = vadd.f32 %v285_v33, %v165_v34  ;;  %v320_v36 = vpop.f32.mrb[1].mxu0 }
 0x13c   :  { %v169_v37 = vmul.f32 0.5, %v166_v35 }
 0x13e   :  { %397 = vtanh.f32 %v169_v37 }
 0x148   :  { %v398_v38 = vpop.eup %397 }
 0x149   :  { %v171_v39 = vmul.f32 0.5, %v398_v38 }
 0x14b   :  { %v172_v40 = vadd.f32 0.5, %v171_v39 }
 0x14d   :  { %354 = vmatmul.mubr.f32.vlgmr.msra.gmra.mrb[0].mxu1 %v172_v40 }
 0x220   :  { %v262_v42 = vpop.f32.mrb[0].mxu1 }
 0x221   :  { %v263_v43 = vadd.f32 %v287_v41, %v262_v42  ;;  %v355_v44 = vpop.f32.mrb[1].mxu1 }
 0x223   :  { %267 = vst.msk [vmem:[#allocation11] sm:$0xff] %vm266_vm2, %v263_v43 }
 0x224   :  { %520 = shalt.err (!%p517_p2)
}
 0x225   :  { %s521_s30 = scalar_lea.hbm %s657_s5, 128 }
 0x226   :  { %p522_p3 = scmp.ne.s32.totalorder %s657_s5, %s521_s30  ;;  %p525_p4 = scmp.lt.u32.totalorder %s521_s30, %s657_s5 }
 0x228   :  { %p527_p5 = pnand %p525_p4, %p522_p3 }
 0x22a   :  { %530 = shalt.err (!%p527_p5)
}
 0x22b   :  { %277 = dma.vmem_to_hbm [thread:$0]  %s275_s27, 128, %s657_s5, [#allocation4]  }
 0x22c   :  { %537 = dma.done.wait [#allocation4], 128  }
 0x22d   :  { %538 = vsyncadd [#allocation4], 4294967168 }
 0x22e   :  { %281 = vsyncpa [#allocation3], 1 }
 0x22f   :  { %282 = vsyncpa [#allocation6], 1 }
 0x230   :  { %283 = vsyncpa [#allocation9], 1 }
 0x231   :  { %284 = vsyncpa [#allocation4], 1 }

</bundles_post_ra>
